<compile_context>
chip_gen: v5e
topology: v5e:2x2
jax: 0.10.0
libtpu: 0.0.40
codegen_flags: <defaults>
</compile_context>

<pallas_src>
import functools

import jax
import jax.numpy as jnp
from jax.experimental import pallas as pl
from jax.experimental.pallas import tpu as pltpu

_MIB = 1024 * 1024


def _round_up(x, n):
    return ((x + n - 1) // n) * n


def _gelu(x, approximate=False):
    if approximate:
        # tanh approximation -> EUP slot (cheaper on v5e where VALU is tight).
        return jax.nn.gelu(x, approximate=True)
    # nn.GELU() default = exact erf-based GELU (on the f32 accumulator).
    return 0.5 * x * (1.0 + jax.lax.erf(x * 0.7071067811865476))


def _vmem_capacity_bytes():
    try:
        return int(pltpu.get_tpu_info().vmem_capacity_bytes)
    except Exception:
        return 64 * _MIB  # conservative fallback (v7x per-TC VMEM)


# --------------------------------------------------------------------------
# Kernels
# --------------------------------------------------------------------------
def _mlp_kernel_resident(x_ref, w1_ref, b1_ref, w2_ref, b2_ref, o_ref, *,
                         approx_gelu):
    """Weights fully VMEM-resident: one row tile per step, no scratch."""
    h = jnp.dot(x_ref[...], w1_ref[...], preferred_element_type=jnp.float32)
    h = _gelu(h + b1_ref[...].astype(jnp.float32), approx_gelu)
    y = jnp.dot(h.astype(w2_ref.dtype), w2_ref[...],
                preferred_element_type=jnp.float32)
    # drop = nn.Dropout(0.0) -> identity
    o_ref[...] = (y + b2_ref[...].astype(jnp.float32)).astype(o_ref.dtype)


def _mlp_kernel_slabbed(x_ref, w1_ref, b1_ref, w2_ref, b2_ref, o_ref, acc_ref,
                        *, approx_gelu):
    """Hidden dim slabbed over an innermost 'arbitrary' axis, f32 accumulator."""
    h_step = pl.program_id(1)

    @pl.when(h_step == 0)
    def _():
        acc_ref[...] = jnp.zeros_like(acc_ref)

    h = jnp.dot(x_ref[...], w1_ref[...], preferred_element_type=jnp.float32)
    h = _gelu(h + b1_ref[...].astype(jnp.float32), approx_gelu)
    acc_ref[...] += jnp.dot(h.astype(w2_ref.dtype), w2_ref[...],
                            preferred_element_type=jnp.float32)

    @pl.when(h_step == pl.num_programs(1) - 1)
    def _():
        # drop = nn.Dropout(0.0) -> identity
        o_ref[...] = (acc_ref[...] + b2_ref[...].astype(jnp.float32)
                      ).astype(o_ref.dtype)


# --------------------------------------------------------------------------
# Wrapper
# --------------------------------------------------------------------------
@functools.partial(jax.jit,
                   static_argnames=("tile_m", "tile_h", "compute_dtype",
                                    "approx_gelu"))
def mlp_forward(x, w1, b1, w2, b2, *, tile_m=None, tile_h=None,
                compute_dtype=jnp.bfloat16, approx_gelu=False):
    """x: (..., D).  Returns (..., out_features), same dtype as x."""
    orig_shape = x.shape
    out_dtype = x.dtype
    d_in = orig_shape[-1]
    x2 = x.reshape(-1, d_in)
    m = x2.shape[0]
    hidden = w1.shape[1]
    d_out = w2.shape[1]

    # Mixed precision: bf16 operands on the MXU, f32 accumulation in-kernel.
    cdt = jnp.dtype(compute_dtype) if compute_dtype is not None else x2.dtype
    xc = x2.astype(cdt)
    w1c = w1.astype(cdt)
    w2c = w2.astype(cdt)
    b1_2d = b1.reshape(1, hidden)
    b2_2d = b2.reshape(1, d_out)

    cbytes = cdt.itemsize
    obytes = jnp.dtype(out_dtype).itemsize
    bbytes = b1_2d.dtype.itemsize

    # ---- row tile: aligned to dtype sublane packing -------------------------
    sub = 16 if cbytes == 2 else (32 if cbytes == 1 else 8)
    tile_m_default = tile_m is None
    if tile_m_default:
        tile_m = 1024 if cbytes <= 2 else 512
    tile_m = max(sub, _round_up(min(tile_m, _round_up(m, sub)), sub))
    if tile_m_default:
        # v7x shards the 'parallel' row axis across 2 TCs: prefer >= 2 tiles.
        if pl.cdiv(m, tile_m) == 1 and m >= 2 * sub:
            tile_m = _round_up(pl.cdiv(m, 2), sub)
        # Feed the MXU full tiles on the clamped medium-M path.
        if tile_m > 128:
            tile_m = _round_up(tile_m, 128)
    num_row_tiles = pl.cdiv(m, tile_m)

    # ---- generation-aware VMEM budget ---------------------------------------
    capacity = _vmem_capacity_bytes()
    budget = (capacity * 3) // 4   # headroom for compiler scratch / semaphores

    def _footprint(th, resident):
        fp = 2 * tile_m * d_in * cbytes                    # x tile (dbl buf)
        fp += 2 * (d_in * th + th * d_out) * cbytes        # weight blocks
        fp += 2 * (th + d_out) * bbytes                    # biases
        fp += 2 * tile_m * d_out * obytes                  # out tile (dbl buf)
        fp += tile_m * th * (4 + cbytes)                   # fc1/GELU intermediate
        if not resident:
            fp += tile_m * d_out * 4                       # f32 accumulator
        return fp

    # ---- hidden tiling: weights VMEM-resident whenever they fit -------------
    if tile_h is None:
        if _footprint(hidden, resident=True) <= budget:
            tile_h = hidden
        else:
            tile_h = hidden                                 # fallback
            t = (hidden // 128) * 128
            while t >= 128:
                if hidden % t == 0 and _footprint(t, resident=False) <= budget:
                    tile_h = t
                    break
                t -= 128
    assert hidden % tile_h == 0, "tile_h must divide hidden_features"
    resident = (tile_h == hidden)

    footprint = _footprint(tile_h, resident)
    vmem_limit = int(max(32 * _MIB, min(budget, footprint + 8 * _MIB)))
    if footprint + 4 * _MIB > vmem_limit:
        vmem_limit = int(min(capacity, footprint + 8 * _MIB))

    # ---- accurate scheduler hint --------------------------------------------
    weight_reads = 1 if resident else num_row_tiles
    cost = pl.CostEstimate(
        flops=2 * m * d_in * hidden + 2 * m * hidden * d_out,
        transcendentals=m * hidden,
        bytes_accessed=int(m * d_in * cbytes
                           + weight_reads * (d_in * hidden + hidden * d_out) * cbytes
                           + (hidden + d_out) * bbytes
                           + m * d_out * obytes),
    )

    if resident:
        kernel = functools.partial(_mlp_kernel_resident, approx_gelu=approx_gelu)
        grid = (num_row_tiles,)
        in_specs = [
            pl.BlockSpec((tile_m, d_in), lambda i: (i, 0)),
            pl.BlockSpec((d_in, hidden), lambda i: (0, 0)),   # constant index
            pl.BlockSpec((1, hidden), lambda i: (0, 0)),      #  -> fetched once,
            pl.BlockSpec((hidden, d_out), lambda i: (0, 0)),  #  VMEM resident
            pl.BlockSpec((1, d_out), lambda i: (0, 0)),
        ]
        out_specs = pl.BlockSpec((tile_m, d_out), lambda i: (i, 0))
        scratch_shapes = []
        dim_sem = ("parallel",)
    else:
        kernel = functools.partial(_mlp_kernel_slabbed, approx_gelu=approx_gelu)
        grid = (num_row_tiles, hidden // tile_h)
        in_specs = [
            pl.BlockSpec((tile_m, d_in), lambda i, h: (i, 0)),
            pl.BlockSpec((d_in, tile_h), lambda i, h: (0, h)),
            pl.BlockSpec((1, tile_h), lambda i, h: (0, h)),
            pl.BlockSpec((tile_h, d_out), lambda i, h: (h, 0)),
            pl.BlockSpec((1, d_out), lambda i, h: (0, 0)),
        ]
        out_specs = pl.BlockSpec((tile_m, d_out), lambda i, h: (i, 0))
        scratch_shapes = [pltpu.VMEM((tile_m, d_out), jnp.float32)]
        dim_sem = ("parallel", "arbitrary")

    out = pl.pallas_call(
        kernel,
        out_shape=jax.ShapeDtypeStruct((m, d_out), out_dtype),
        grid_spec=pltpu.PrefetchScalarGridSpec(
            num_scalar_prefetch=0,
            grid=grid,
            in_specs=in_specs,
            out_specs=out_specs,
            scratch_shapes=scratch_shapes,
        ),
        compiler_params=pltpu.CompilerParams(
            dimension_semantics=dim_sem,
            vmem_limit_bytes=vmem_limit,
        ),
        cost_estimate=cost,
    )(xc, w1c, b1_2d, w2c, b2_2d)

    return out.reshape(*orig_shape[:-1], d_out)


# --------------------------------------------------------------------------
# Params / reference
# --------------------------------------------------------------------------
def init_mlp_params(key, in_features, hidden_features, out_features,
                    dtype=jnp.float32):
    """nn.Linear-style init; weights stored transposed: w1 (in, hidden),
    w2 (hidden, out)."""
    k1, k2, k3, k4 = jax.random.split(key, 4)
    lim1 = 1.0 / (in_features ** 0.5)
    lim2 = 1.0 / (hidden_features ** 0.5)
    w1 = jax.random.uniform(k1, (in_features, hidden_features), dtype, -lim1, lim1)
    b1 = jax.random.uniform(k2, (hidden_features,), dtype, -lim1, lim1)
    w2 = jax.random.uniform(k3, (hidden_features, out_features), dtype, -lim2, lim2)
    b2 = jax.random.uniform(k4, (out_features,), dtype, -lim2, lim2)
    return w1, b1, w2, b2


def _mlp_ref(x, w1, b1, w2, b2):
    h = x @ w1 + b1
    h = 0.5 * h * (1.0 + jax.lax.erf(h / jnp.sqrt(2.0)))
    return h @ w2 + b2


if __name__ == "__main__":
    key = jax.random.PRNGKey(0)
    kx1, kp1, kx2, kp2, kx3 = jax.random.split(key, 5)

    # Case 1: f32 compute (exact parity vs reference), resident weights,
    # 2-step parallel row grid (M=16 -> two 8-row tiles).
    B, N, D, H = 2, 8, 16, 32
    x = jax.random.normal(kx1, (B, N, D), dtype=jnp.float32)
    p = init_mlp_params(kp1, D, H, D)
    y = jax.block_until_ready(mlp_forward(x, *p, compute_dtype=jnp.float32))
    assert y.shape == (B, N, D)
    assert jnp.allclose(y, _mlp_ref(x, *p), atol=1e-5, rtol=1e-5)

    # Case 2: default bf16 compute, forced hidden-dim slabbing (2 h-steps,
    # f32 accumulator) and a ragged last row tile (M=20, tile_m=16).
    B2, N2, D2, H2 = 2, 10, 16, 256
    x2 = jax.random.normal(kx2, (B2, N2, D2), dtype=jnp.float32)
    p2 = init_mlp_params(kp2, D2, H2, D2)
    y2 = jax.block_until_ready(mlp_forward(x2, *p2, tile_m=16, tile_h=128))
    assert y2.shape == (B2, N2, D2)
    assert jnp.allclose(y2, _mlp_ref(x2, *p2), atol=5e-2, rtol=5e-2)

    # Case 3: fully defaulted path (bf16 compute, auto weight residency).
    x3 = jax.random.normal(kx3, (4, 8, D), dtype=jnp.float32)
    y3 = jax.block_until_ready(mlp_forward(x3, *p))
    assert y3.shape == (4, 8, D)
    assert jnp.allclose(y3, _mlp_ref(x3, *p), atol=5e-2, rtol=5e-2)

    print("KERNEL_OK")
</pallas_src>

<mosaic_0001>
module attributes {stable_mosaic.version = 11 : i64} {
  func.func @_mlp_kernel_resident(%arg0: i32, %arg1: memref<8x16xf32, #tpu.memory_space<vmem>>, %arg2: memref<16x32xf32, #tpu.memory_space<vmem>>, %arg3: memref<1x32xf32, #tpu.memory_space<vmem>>, %arg4: memref<32x16xf32, #tpu.memory_space<vmem>>, %arg5: memref<1x16xf32, #tpu.memory_space<vmem>>, %arg6: memref<8x16xf32, #tpu.memory_space<vmem>>) attributes {dimension_semantics = [#tpu.dimension_semantics<parallel>], iteration_bounds = array<i64: 2>, scalar_prefetch = 0 : i64, scratch_operands = 0 : i64, tpu.core_type = #tpu.core_type<tc>, window_params = [{transform_indices = @transform_0, window_bounds = array<i64: 8, 16>}, {pipeline_mode = #tpu.pipeline_mode<synchronous>, transform_indices = @transform_1, window_bounds = array<i64: 16, 32>}, {pipeline_mode = #tpu.pipeline_mode<synchronous>, transform_indices = @transform_2, window_bounds = array<i64: 1, 32>}, {pipeline_mode = #tpu.pipeline_mode<synchronous>, transform_indices = @transform_3, window_bounds = array<i64: 32, 16>}, {pipeline_mode = #tpu.pipeline_mode<synchronous>, transform_indices = @transform_4, window_bounds = array<i64: 1, 16>}, {transform_indices = @transform_5, window_bounds = array<i64: 8, 16>}]} {
    %c0 = arith.constant 0 : index
    %c0_0 = arith.constant 0 : index
    %0 = vector.load %arg1[%c0, %c0_0] : memref<8x16xf32, #tpu.memory_space<vmem>>, vector<8x16xf32>
    %c0_1 = arith.constant 0 : index
    %c0_2 = arith.constant 0 : index
    %1 = vector.load %arg2[%c0_1, %c0_2] : memref<16x32xf32, #tpu.memory_space<vmem>>, vector<16x32xf32>
    %cst = arith.constant dense<0.000000e+00> : vector<8x32xf32>
    %2 = tpu.matmul %0, %1, %cst {dimension_numbers = #tpu.dot_dimension_numbers<[1], [0], [0], [1], [0, 0, 1, 1], [], []>} : vector<8x16xf32>, vector<16x32xf32>, vector<8x32xf32> -> vector<8x32xf32>
    %c0_3 = arith.constant 0 : index
    %c0_4 = arith.constant 0 : index
    %3 = vector.load %arg3[%c0_3, %c0_4] : memref<1x32xf32, #tpu.memory_space<vmem>>, vector<1x32xf32>
    %4 = vector.broadcast %3 : vector<1x32xf32> to vector<8x32xf32>
    %5 = arith.addf %2, %4 : vector<8x32xf32>
    %cst_5 = arith.constant 5.000000e-01 : f32
    %6 = vector.broadcast %cst_5 : f32 to vector<8x32xf32>
    %7 = arith.mulf %6, %5 : vector<8x32xf32>
    %cst_6 = arith.constant 0.707106769 : f32
    %8 = vector.broadcast %cst_6 : f32 to vector<8x32xf32>
    %9 = arith.mulf %5, %8 : vector<8x32xf32>
    %10 = math.erf %9 : vector<8x32xf32>
    %cst_7 = arith.constant 1.000000e+00 : f32
    %11 = vector.broadcast %cst_7 : f32 to vector<8x32xf32>
    %12 = arith.addf %11, %10 : vector<8x32xf32>
    %13 = arith.mulf %7, %12 : vector<8x32xf32>
    %c0_8 = arith.constant 0 : index
    %c0_9 = arith.constant 0 : index
    %14 = vector.load %arg4[%c0_8, %c0_9] : memref<32x16xf32, #tpu.memory_space<vmem>>, vector<32x16xf32>
    %cst_10 = arith.constant dense<0.000000e+00> : vector<8x16xf32>
    %15 = tpu.matmul %13, %14, %cst_10 {dimension_numbers = #tpu.dot_dimension_numbers<[1], [0], [0], [1], [0, 0, 1, 1], [], []>} : vector<8x32xf32>, vector<32x16xf32>, vector<8x16xf32> -> vector<8x16xf32>
    %c0_11 = arith.constant 0 : index
    %c0_12 = arith.constant 0 : index
    %16 = vector.load %arg5[%c0_11, %c0_12] : memref<1x16xf32, #tpu.memory_space<vmem>>, vector<1x16xf32>
    %17 = vector.broadcast %16 : vector<1x16xf32> to vector<8x16xf32>
    %18 = arith.addf %15, %17 : vector<8x16xf32>
    %c0_13 = arith.constant 0 : index
    %c0_14 = arith.constant 0 : index
    %19 = vector.load %arg6[%c0_13, %c0_14] : memref<8x16xf32, #tpu.memory_space<vmem>>, vector<8x16xf32>
    tpu.vector_store %arg6[%c0_13, %c0_14], %18 {strides = array<i32>} : memref<8x16xf32, #tpu.memory_space<vmem>>, vector<8x16xf32>,
    return
  }
  func.func @transform_0(%arg0: i32) -> (i32, i32) {
    %c0_i32 = arith.constant 0 : i32
    %c0_i32_0 = arith.constant 0 : i32
    return %arg0, %c0_i32 : i32, i32
  }
  func.func @transform_1(%arg0: i32) -> (i32, i32) {
    %c0_i32 = arith.constant 0 : i32
    %c0_i32_0 = arith.constant 0 : i32
    %c0_i32_1 = arith.constant 0 : i32
    return %c0_i32, %c0_i32_0 : i32, i32
  }
  func.func @transform_2(%arg0: i32) -> (i32, i32) {
    %c0_i32 = arith.constant 0 : i32
    %c0_i32_0 = arith.constant 0 : i32
    %c0_i32_1 = arith.constant 0 : i32
    return %c0_i32, %c0_i32_0 : i32, i32
  }
  func.func @transform_3(%arg0: i32) -> (i32, i32) {
    %c0_i32 = arith.constant 0 : i32
    %c0_i32_0 = arith.constant 0 : i32
    %c0_i32_1 = arith.constant 0 : i32
    return %c0_i32, %c0_i32_0 : i32, i32
  }
  func.func @transform_4(%arg0: i32) -> (i32, i32) {
    %c0_i32 = arith.constant 0 : i32
    %c0_i32_0 = arith.constant 0 : i32
    %c0_i32_1 = arith.constant 0 : i32
    return %c0_i32, %c0_i32_0 : i32, i32
  }
  func.func @transform_5(%arg0: i32) -> (i32, i32) {
    %c0_i32 = arith.constant 0 : i32
    %c0_i32_0 = arith.constant 0 : i32
    return %arg0, %c0_i32 : i32, i32
  }
}

</mosaic_0001>

<bundles_post_ra>
// kernel: mlp_forward.1
= control target key start
LH: loop header
LB: loop body
LE: loop exit
PB: predicated region body
PF: predicated region fallthrough
CT: control target
= control target key end

     0   :  { %10 = vsyncpa [#allocation3], 0  ;;  %s664_s0 = inlined_call_operand.vmem [shape: f32[16,16], index: 0, kind: input, shape index: {}]   ;;  %s665_s1 = inlined_call_operand.vmem [shape: f32[16,32], index: 1, kind: input, shape index: {}]   ;;  %s666_s2 = inlined_call_operand.vmem [shape: f32[1,32], index: 2, kind: input, shape index: {}]   ;;  %s667_s3 = inlined_call_operand.vmem [shape: f32[32,16], index: 3, kind: input, shape index: {}]   ;;  %s668_s4 = inlined_call_operand.vmem [shape: f32[1,16], index: 4, kind: input, shape index: {}]   ;;  %s669_s5 = inlined_call_operand.hbm [shape: f32[16,16], index: 5, kind: output, shape index: {}]  }
   0x1   :  { %12 = vsyncpa [#allocation3 + $0x1], 0  ;;  %s553_s18 = smov 0   ;;  %s555_s19 = smov 0  }
   0x2   :  { %s557_s20 = smov 0   ;;  %s559_s21 = smov 0  }
   0x3 LB: > { %s574_s22 = sadd.s32 4294967295, %s521_s21   ;;  %s403_s23 = sadd.s32 4294967294, %s521_s21   ;;  %s521_s21 = sphi %s559_s21, %s675_s21   ;;  %s517_s20 = sphi %s557_s20, %s674_s20   ;;  %s513_s19 = sphi %s555_s19, %s673_s19   ;;  %s509_s18 = sphi %s553_s18, %s672_s18  }
   0x4   : > { %s578_s24 = sadd.s32 1, %s521_s21   ;;  %s135_s25 = sadd.s32 1, %s517_s20 }
   0x5   : > { %s132_s26 = ssub.s32 %s521_s21, %s578_s24  ;;  %p145_p0 = scmp.ne.s32.totalorder %s517_s20, %s513_s19 }
   0x6   : > { %p133_p1 = scmp.eq.s32.totalorder %s132_s26, 0  ;;  %p146_p2 = scmp.eq.s32.totalorder %s574_s22, 1 }
   0x7   : > { %p151_p3 = scmp.ne.s32.totalorder %s513_s19, %s509_s18  ;;  %p152_p4 = scmp.eq.s32.totalorder %s403_s23, 1 }
   0x8   : > { %s589_s27 = scalar_select %p133_p1, %s517_s20, %s135_s25  }
   0x9   : > { %p591_p5 = por %p146_p2, %p145_p0  ;;  %p595_p6 = por %p152_p4, %p151_p3 }
   0xa   : > { %p406_p7 = scmp.ge.s32.totalorder %s521_s21, 1  ;;  %p189_p8 = scmp.lt.s32.totalorder %s521_s21, 3 }
   0xc   : > { %p190_p9 = pnand %p406_p7, %p189_p8 }
   0xd   : > { %p216_p10 = scmp.lt.s32.totalorder (!%p190_p9), %s574_s22, 1  ;;  %s213_s8 = sand.u32 (!%p190_p9), 1, %s513_s19  }
   0xe   : > { %193 = sbr.rel (%p190_p9) target bundleno = 334 (0x14e), region = 40  ;;  %s329_s25 = scalar_lea.sflag (!%p190_p9), [#allocation3], %s213_s8 }
   0xf   : > { %s479_s7 = scalar_lea.hbm (!%p190_p9), %s669_s5, 16 }
  0x13   : > { %v222_v0 = vld [vmem:[%s665_s1 + $0x8] sm:$0xff]  ;;  %v221_v1 = vld [vmem:[%s665_s1] sm:$0xff]  ;;  %s217_s9 = scalar_select %p216_p10, %s574_s22, 1  ;;  %vm227_vm0 = vcmask 130048   ;;  %v298_v15 = vld [vmem:[%s667_s3 + $0x18] sm:$0xff]  ;;  %vm303_vm5 = vcmask 261120  }
  0x14   : > { %245 = vmatpush.msra.mxu0 %v222_v0  ;;  %v455_v3 = vld [vmem:[%s666_s2] ss:$0 sm:$0xff]  ;;  %v297_v16 = vld [vmem:[%s667_s3 + $0x10] sm:$0xff]  ;;  %319 = vmatpush.msra.mxu1 %v298_v15  ;;  %v296_v19 = vld [vmem:[%s667_s3 + $0x8] sm:$0xff] }
  0x15   : > { %s408_s10 = sshll.u32 %s217_s9, 3  ;;  %v295_v21 = vld [vmem:[%s667_s3] sm:$0xff]  ;;  %s407_s9 = sshll.u32 %s213_s8, 3 }
  0x16   : > { %246 = vmatpush.msra.mxu0 %v221_v1  ;;  %s219_s13 = scalar_lea.vmem %s664_s0, %s408_s10  ;;  %320 = vmatpush.msra.mxu1 %v297_v16  ;;  %s413_s10 = sshll.u32 %s574_s22, 3  ;;  %v456_v49 = vld [vmem:[%s668_s4] ss:$0 sm:$0xff] }
  0x17   : > { %v220_v2 = vld [vmem:[%s219_s13] sm:$0xff]  ;;  %s339_s13 = scalar_lea.hbm %s669_s5, %s413_s10  ;;  %s215_s16 = scalar_lea.vmem [#allocation2], %s407_s9 }
  0x18   : > { %409 = vmatmul.msk.f32.vlgmr.msra.gmra.mxu0 %vm227_vm0, %v220_v2  ;;  %321 = vmatpush.msra.mxu1 %v296_v19  ;;  %s341_s17 = sshll.u32 %s215_s16, 4  ;;  %s343_s23 = sshll.u32 %s339_s13, 4  ;;  %s342_s17 = int_to_ptr.vmem [resolvable:$true] %s341_s17  ;;  %s344_s23 = int_to_ptr.hbm [resolvable:$true] %s343_s23 }
  0x19   : > { %s473_s22 = sshra.s32 %s344_s23, 4  ;;  %s474_s22 = int_to_ptr.hbm [resolvable:$true] %s473_s22 }
  0x1a   : > { %322 = vmatpush.msra.mxu1 %v295_v21  ;;  %s475_s26 = scalar_lea.hbm %s474_s22, 8  ;;  %p480_p0 = scmp.lt.s32.totalorder %s474_s22, %s669_s5 }
  0x1b   : > { %p476_p11 = scmp.ne.s32.totalorder %s474_s22, %s475_s26  ;;  %p481_p1 = scmp.lt.s32.totalorder %s479_s7, %s475_s26 }
  0x1d   : > { %p477_p12 = pnand %p476_p11, %p591_p5  ;;  %p482_p2 = por %p481_p1, %p480_p0 }
  0x1f   : > { %p478_p13 = pneg %p477_p12 }
  0x21   : > { %p483_p3 = pnand %p482_p2, %p478_p13 }
  0x95   : > { %v248_v4 = vpop.f32.mrf.mxu0 }
  0x96   : > { %v249_v5 = vadd.f32 %v455_v3, %v248_v4 }
  0x98   : > { %v252_v6 = vmul.f32 0.70710677, %v249_v5  ;;  %v251_v46 = vmul.f32 0.5, %v249_v5 }
  0x9a   : > { %v253_v7 = vmul.f32 %v252_v6, %v252_v6 }
  0x9c   : > { %v254_v8 = vmin.f32 %v253_v7, 16.0 }
  0x9e   : > { %v255_v9 = vmul.f32 2.1237322e-06, %v254_v8  ;;  %v266_v10 = vmul.f32 3.8918573e-05, %v254_v8 }
  0xa0   : > { %v256_v11 = vadd.f32 0.00028619796, %v255_v9  ;;  %v267_v12 = vadd.f32 0.001143296, %v266_v10 }
  0xa2   : > { %v257_v13 = vmul.f32 %v256_v11, %v254_v8  ;;  %v268_v14 = vmul.f32 %v267_v12, %v254_v8 }
  0xa4   : > { %v269_v17 = vadd.f32 0.014752088, %v268_v14  ;;  %v258_v18 = vadd.f32 0.0036580483, %v257_v13 }
  0xa6   : > { %v270_v20 = vmul.f32 %v269_v17, %v254_v8  ;;  %v259_v23 = vmul.f32 %v258_v18, %v254_v8 }
  0xa8   : > { %v271_v22 = vadd.f32 0.112945676, %v270_v20  ;;  %v260_v26 = vadd.f32 0.05243302, %v259_v23 }
  0xaa   : > { %v272_v24 = vmul.f32 %v271_v22, %v254_v8  ;;  %v261_v29 = vmul.f32 %v260_v26, %v254_v8 }
  0xac   : > { %v273_v25 = vadd.f32 0.4994258, %v272_v24  ;;  %v262_v30 = vadd.f32 0.18741608, %v261_v29 }
  0xae   : > { %v274_v27 = vmul.f32 %v273_v25, %v254_v8  ;;  %v263_v32 = vmul.f32 %v262_v30, %v254_v8 }
  0xb0   : > { %v275_v28 = vadd.f32 1.0, %v274_v27  ;;  %v264_v36 = vadd.f32 1.1283791, %v263_v32 }
  0xb2   : > { %457 = vrcp.f32 %v275_v28  ;;  %v287_v35 = vand.u32 2147483648, %v275_v28  ;;  %v285_v38 = vand.u32 2147483647, %v275_v28  ;;  %vm281_vm2 = vweird.f32 %v275_v28 }
  0xb3   : > { %v265_v41 = vmul.f32 %v264_v36, %v252_v6 }
  0xb4   : > { %v288_v40 = vor.u32 1.1754944e-38, %v287_v35  ;;  %vm286_vm4 = vcmp.eq.f32.partialorder %v285_v38, 8.507059e+37 }
  0xb8   : > { %v458_v31 = vpop.eup %457 }
  0xb9   : > { %v277_v33 = vmul.f32 %v458_v31, %v275_v28  ;;  %vm282_vm1 = vweird.f32 %v458_v31 }
  0xba   : > { %vm283_vm3 = vmor %vm281_vm2, %vm282_vm1 }
  0xbb   : > { %v278_v34 = vsub.f32 1.0, %v277_v33 }
  0xbd   : > { %v279_v37 = vmul.f32 %v458_v31, %v278_v34 }
  0xbf   : > { %v280_v39 = vadd.f32 %v458_v31, %v279_v37 }
  0xc1   : > { %v284_v42 = vsel %vm283_vm3, %v458_v31, %v280_v39 }
  0xc2   : > { %v289_v43 = vsel %vm286_vm4, %v288_v40, %v284_v42 }
  0xc3   : > { %v290_v44 = vmul.f32 %v289_v43, %v265_v41 }
  0xc5   : > { %v410_v45 = vclamps-f32 %v290_v44, 1.0 }
  0xc7   : > { %v293_v47 = vadd.f32 1.0, %v410_v45 }
  0xc9   : > { %v294_v48 = vmul.f32 %v293_v47, %v251_v46 }
  0xcb   : > { %411 = vmatmul.msk.f32.vlgmr.msra.gmra.mxu1 %vm303_vm5, %v294_v48 }
 0x148   : > { %v324_v50 = vpop.f32.mrf.mxu1 }
 0x149   : > { %v325_v51 = vadd.f32 %v456_v49, %v324_v50 }
 0x14b   : > { %327 = vst.msk [vmem:[%s215_s16] sm:$0xff] %vm227_vm0, %v325_v51 }
 0x14c   : > { %486 = shalt.err (!%p483_p3)
}
 0x14d   : > { %416 = dma.vmem_to_hbm [thread:$0]  (%p591_p5), %s342_s17, 128, %s344_s23, %s329_s25  }
 0x14e PF: > { %p422_p4 = scmp.ge.s32.totalorder %s521_s21, 2  ;;  %s355_s8 = sand.u32 1, %s509_s18  }
 0x14f   : > { %s356_s11 = scalar_lea.sflag [#allocation3], %s355_s8 }
 0x150   : > { %p419_p7 = pnand %p422_p4, %p595_p6 }
 0x152   : > { %p420_p8 = pneg %p419_p7 }
 0x154   : > { %504 = dma.done.wait (%p420_p8), %s356_s11, 128  }
 0x155   : > { %506 = vsyncadd (%p420_p8), %s356_s11, 4294967168  ;;  %p15_p9 = scmp.ge.s32.totalorder %s578_s24, 4   ;;  %s672_s18 = smov %s513_s19 }
 0x156   : > { %s673_s19 = smov %s517_s20  ;;  %s674_s20 = smov %s589_s27 }
 0x157   : > { %s675_s21 = smov %s578_s24  ;;  %17 = sbr.rel (!%p15_p9) target bundleno = 3 (0x3), region = 75 }
 0x15c   :  { %362 = vsyncpa [#allocation3], 1 }
 0x15d   :  { %364 = vsyncpa [#allocation3 + $0x1], 1 }

</bundles_post_ra>
